<compile_context>
chip_gen: v5e
topology: v5e:2x2
jax: 0.10.0
libtpu: 0.0.40
codegen_flags: <defaults>
</compile_context>

<pallas_src>
import functools

import jax
import jax.numpy as jnp
import numpy as np
from jax.experimental import pallas as pl
from jax.experimental.pallas import tpu as pltpu

_MIB = 1024 * 1024


def _round_up(x: int, m: int) -> int:
    return (x + m - 1) // m * m


def _vmem_limit(nbytes: int) -> int:
    # Real footprint + headroom for compiler temporaries; clamp to a value
    # that is valid on every generation (v7x physical VMEM is 64 MiB / TC).
    return int(min(max(nbytes * 1.5 + 4 * _MIB, 4 * _MIB), 64 * _MIB))


def _resident_spec(block_shape, index_map):
    """Constant-index BlockSpec.  Request a single buffer (the block never
    changes, so the second pipeline buffer is pure VMEM waste); fall back to
    the default spec if pipeline_mode/Buffered is unavailable."""
    if hasattr(pl, "Buffered"):
        try:
            return pl.BlockSpec(block_shape, index_map,
                                pipeline_mode=pl.Buffered(1))
        except Exception:  # noqa: BLE001 - defensive API-compat fallback
            pass
    return pl.BlockSpec(block_shape, index_map)


def _pick_hidden_chunk(H: int) -> int:
    """Chunk of the intermediate hidden dim for the streaming (small-batch)
    path: a multiple of 128 that divides H, sized for ~2-4 chunks."""
    for tk in (256, 384, 512, 128):
        if H % tk == 0:
            return tk
    return H  # H not a multiple of 128 -> single chunk (degenerates cleanly)


# ----------------------------------------------------------------------------
# Kernel A: large-batch path, row-tiled grid (weights resident in VMEM).
# ----------------------------------------------------------------------------
def _head_kernel_rows(x_ref, w1_ref, b1_ref, w2_ref, b2_ref, logits_ref):
    """logits = tanh(x @ W1 + b1) @ W2 + b2 for one row tile.

    x_ref:      (TB, H)  f32 CLS features (cast to weight dtype in-kernel)
    w1_ref:     (H, H)   dense weight (in, out), bf16 by default
    b1_ref:     (1, H)   dense bias, f32
    w2_ref:     (H, Lp)  out_proj weight, lane-padded
    b2_ref:     (1, Lp)  out_proj bias, lane-padded, f32
    logits_ref: (TB, Lp) f32 lane-dense output tile
    """
    x = x_ref[...].astype(w1_ref.dtype)                  # in-kernel bf16 cast
    h = jnp.dot(x, w1_ref[...], preferred_element_type=jnp.float32) + b1_ref[...]
    h = jnp.tanh(h.astype(w2_ref.dtype))                 # tanh on downcast h
    logits = jnp.dot(h, w2_ref[...], preferred_element_type=jnp.float32) + b2_ref[...]
    logits_ref[...] = logits.astype(logits_ref.dtype)


# ----------------------------------------------------------------------------
# Kernel B: small-batch path, stream W1/W2 in chunks of the hidden dim so the
# weight DMA pipelines against MXU/EUP work (reduction grid + accumulator).
# ----------------------------------------------------------------------------
def _head_kernel_stream(x_ref, w1_ref, b1_ref, w2_ref, b2_ref, logits_ref,
                        acc_ref):
    """Per chunk k of the intermediate hidden dim:
         h_k   = tanh(x @ W1[:, k] + b1[k])      (x resident, W1 chunk streamed)
         acc  += h_k @ W2[k, :]                   (W2 chunk streamed)
       finalize: logits = acc + b2
    """
    k = pl.program_id(0)

    @pl.when(k == 0)
    def _init():
        acc_ref[...] = jnp.zeros_like(acc_ref)

    x = x_ref[...].astype(w1_ref.dtype)
    h = jnp.dot(x, w1_ref[...], preferred_element_type=jnp.float32) + b1_ref[...]
    h = jnp.tanh(h.astype(w2_ref.dtype))
    acc_ref[...] += jnp.dot(h, w2_ref[...], preferred_element_type=jnp.float32)

    @pl.when(k == pl.num_programs(0) - 1)
    def _finalize():
        logits_ref[...] = (acc_ref[...] + b2_ref[...]).astype(logits_ref.dtype)


# ----------------------------------------------------------------------------
# One-time parameter preparation (outside the per-call hot path).
# ----------------------------------------------------------------------------
def prepare_head_params(w_dense, b_dense, w_out, b_out, *, use_bf16=True):
    """Pre-cast weights to bf16 and lane-pad out_proj to a multiple of 128.

    Done once at init so per-call HBM traffic is only the kernel's own reads.
    Biases stay f32 (added to the f32 accumulator inside the kernel).
    """
    H = w_dense.shape[0]
    L = w_out.shape[1]
    Lp = _round_up(L, 128)
    wdt = jnp.bfloat16 if use_bf16 else jnp.float32

    w1 = jnp.asarray(w_dense, wdt)                       # (H, H)  in x out
    b1 = jnp.asarray(b_dense, jnp.float32).reshape(1, H)
    w2 = jnp.asarray(w_out, jnp.float32)
    b2 = jnp.asarray(b_out, jnp.float32).reshape(1, L)
    if Lp != L:
        w2 = jnp.pad(w2, ((0, 0), (0, Lp - L)))
        b2 = jnp.pad(b2, ((0, 0), (0, Lp - L)))
    return {"w1": w1, "b1": b1, "w2": w2.astype(wdt), "b2": b2,
            "num_labels": L}


# ----------------------------------------------------------------------------
# Wrapper: padding / tiling glue in plain JAX, compute in Pallas.
# ----------------------------------------------------------------------------
@functools.partial(jax.jit, static_argnames=("num_labels", "block_rows"))
def roberta_classification_head(features, w1, b1, w2, b2, *, num_labels,
                                block_rows=None):
    """RobertaClassificationHeadBase.forward(features) -> (logits, weight).

    `w1/b1/w2/b2` must come from prepare_head_params (bf16 + lane-padded).
    """
    B, S, H = features.shape
    L = num_labels
    Lp = w2.shape[1]                     # already lane-padded (multiple of 128)
    wbytes = jnp.dtype(w1.dtype).itemsize

    # weight = features[:, 0, :] — returned as-is (f32) and fed to the head.
    # (It is a module output, so it is materialized regardless; the kernel
    #  reads it back as its activation input.)
    weight = features[:, 0, :]                                    # (B, H)

    # Row tile: multiple of 8 sublanes; default 512 rows (amortizes per-step
    # overhead / ~85% of HBM roofline per measured tiling data).
    if block_rows is None:
        block_rows = 512
    TB = min(_round_up(block_rows, 8), _round_up(B, 8))
    Bp = _round_up(B, TB)
    x = weight if Bp == B else jnp.pad(weight, ((0, Bp - B), (0, 0)))

    n_row_tiles = Bp // TB

    if n_row_tiles == 1:
        # ---------------- Small-batch: stream the weights ----------------
        TK = _pick_hidden_chunk(H)
        grid = (H // TK,)
        footprint = (
            2 * Bp * H * 4            # x (worst case if single-buffer unavail.)
            + 2 * H * TK * wbytes     # W1 column chunk, double-buffered
            + 2 * TK * Lp * wbytes    # W2 row chunk, double-buffered
            + 2 * TK * 4 + 2 * Lp * 4     # bias chunks
            + 2 * Bp * Lp * 4             # output tile + f32 accumulator
            + Bp * TK * 4                 # h intermediate
        )
        logits_padded = pl.pallas_call(
            _head_kernel_stream,
            out_shape=jax.ShapeDtypeStruct((Bp, Lp), jnp.float32),
            grid_spec=pltpu.PrefetchScalarGridSpec(
                num_scalar_prefetch=0,
                grid=grid,
                in_specs=[
                    _resident_spec((Bp, H), lambda k: (0, 0)),   # x resident
                    pl.BlockSpec((H, TK), lambda k: (0, k)),     # W1 chunk
                    pl.BlockSpec((1, TK), lambda k: (0, k)),     # b1 chunk
                    pl.BlockSpec((TK, Lp), lambda k: (k, 0)),    # W2 chunk
                    _resident_spec((1, Lp), lambda k: (0, 0)),   # b2 resident
                ],
                out_specs=pl.BlockSpec((Bp, Lp), lambda k: (0, 0)),
                scratch_shapes=[pltpu.VMEM((Bp, Lp), jnp.float32)],
            ),
            compiler_params=pltpu.CompilerParams(
                dimension_semantics=("arbitrary",),   # reduction over chunks
                vmem_limit_bytes=_vmem_limit(footprint),
            ),
        )(x, w1, b1, w2, b2)
    else:
        # ---------------- Large-batch: row-tiled grid ----------------
        grid = (n_row_tiles,)
        footprint = (
            2 * TB * H * 4            # x row tiles, double-buffered
            + 2 * TB * Lp * 4         # output tiles, double-buffered
            + 2 * H * H * wbytes      # W1 (worst case if single-buffer unavail.)
            + 2 * H * Lp * wbytes     # W2
            + 2 * H * 4 + 2 * Lp * 4  # biases
            + TB * H * 4              # h intermediate
        )
        # "parallel" duplicates the resident weights into each v7x core's
        # private VMEM -> only worth it when there are enough row tiles.
        sem = "parallel" if n_row_tiles > 4 else "arbitrary"
        logits_padded = pl.pallas_call(
            _head_kernel_rows,
            out_shape=jax.ShapeDtypeStruct((Bp, Lp), jnp.float32),
            grid_spec=pltpu.PrefetchScalarGridSpec(
                num_scalar_prefetch=0,
                grid=grid,
                in_specs=[
                    pl.BlockSpec((TB, H), lambda i: (i, 0)),     # row tile
                    _resident_spec((H, H), lambda i: (0, 0)),    # W1 resident
                    _resident_spec((1, H), lambda i: (0, 0)),    # b1 resident
                    _resident_spec((H, Lp), lambda i: (0, 0)),   # W2 resident
                    _resident_spec((1, Lp), lambda i: (0, 0)),   # b2 resident
                ],
                out_specs=pl.BlockSpec((TB, Lp), lambda i: (i, 0)),
            ),
            compiler_params=pltpu.CompilerParams(
                dimension_semantics=(sem,),
                vmem_limit_bytes=_vmem_limit(footprint),
            ),
        )(x, w1, b1, w2, b2)

    logits = logits_padded[:B, :L]
    return logits, weight


# ----------------------------------------------------------------------------
# Deterministic parameter init + pure-JAX reference + demo
# ----------------------------------------------------------------------------
def init_params(key, hidden_size, num_labels):
    ks = jax.random.split(key, 4)
    scale = 0.02
    return {
        # classifier.dense: Linear(H, H)   (stored in x out, i.e. torch W^T)
        "w_dense": scale * jax.random.normal(ks[0], (hidden_size, hidden_size), jnp.float32),
        "b_dense": scale * jax.random.normal(ks[1], (hidden_size,), jnp.float32),
        # classifier.out_proj: Linear(H, num_labels)
        "w_out":   scale * jax.random.normal(ks[2], (hidden_size, num_labels), jnp.float32),
        "b_out":   scale * jax.random.normal(ks[3], (num_labels,), jnp.float32),
    }


def _reference_head(features, p):
    weight = features[:, 0, :]
    h = jnp.tanh(weight @ p["w_dense"] + p["b_dense"])
    logits = h @ p["w_out"] + p["b_out"]
    return logits, weight


if __name__ == "__main__":
    B, S, H, L = 2, 8, 32, 3

    key = jax.random.PRNGKey(0)
    k_feat, k_params = jax.random.split(key)

    features = jax.random.normal(k_feat, (B, S, H), jnp.float32)
    params = init_params(k_params, H, L)

    # One-time weight preparation (bf16 cast + lane padding), outside hot path.
    prep = prepare_head_params(params["w_dense"], params["b_dense"],
                               params["w_out"], params["b_out"], use_bf16=True)

    logits, weight = roberta_classification_head(
        features, prep["w1"], prep["b1"], prep["w2"], prep["b2"],
        num_labels=prep["num_labels"],
    )
    jax.block_until_ready((logits, weight))

    assert logits.shape == (B, L)
    assert weight.shape == (B, H)
    assert weight.dtype == features.dtype

    ref_logits, ref_weight = _reference_head(features, params)
    np.testing.assert_allclose(np.asarray(weight), np.asarray(ref_weight),
                               rtol=1e-6, atol=1e-6)
    # bf16 matmul inputs (f32 accumulation) -> relaxed tolerance.
    np.testing.assert_allclose(np.asarray(logits), np.asarray(ref_logits),
                               rtol=2e-2, atol=2e-2)

    print("KERNEL_OK")
</pallas_src>

<mosaic_0001>
module attributes {stable_mosaic.version = 11 : i64} {
  func.func @_head_kernel_stream(%arg0: i32, %arg1: memref<8x32xf32, #tpu.memory_space<vmem>>, %arg2: memref<32x32xbf16, #tpu.memory_space<vmem>>, %arg3: memref<1x32xf32, #tpu.memory_space<vmem>>, %arg4: memref<32x128xbf16, #tpu.memory_space<vmem>>, %arg5: memref<1x128xf32, #tpu.memory_space<vmem>>, %arg6: memref<8x128xf32, #tpu.memory_space<vmem>>, %arg7: memref<8x128xf32, #tpu.memory_space<vmem>>) attributes {dimension_semantics = [#tpu.dimension_semantics<arbitrary>], iteration_bounds = array<i64: 1>, scalar_prefetch = 0 : i64, scratch_operands = 1 : i64, tpu.core_type = #tpu.core_type<tc>, window_params = [{pipeline_mode = #tpu.pipeline_mode<synchronous>, transform_indices = @transform_0, window_bounds = array<i64: 8, 32>}, {transform_indices = @transform_1, window_bounds = array<i64: 32, 32>}, {transform_indices = @transform_2, window_bounds = array<i64: 1, 32>}, {transform_indices = @transform_3, window_bounds = array<i64: 32, 128>}, {pipeline_mode = #tpu.pipeline_mode<synchronous>, transform_indices = @transform_4, window_bounds = array<i64: 1, 128>}, {pipeline_mode = #tpu.pipeline_mode<synchronous>, transform_indices = @transform_5, window_bounds = array<i64: 8, 128>}]} {
    %c0_i32 = arith.constant 0 : i32
    %0 = arith.cmpi eq, %arg0, %c0_i32 : i32
    %1 = arith.extui %0 : i1 to i32
    %c0_i32_0 = arith.constant 0 : i32
    %2 = arith.cmpi ne, %1, %c0_i32_0 : i32
    scf.if %2 {
      %cst_15 = arith.constant 0.000000e+00 : f32
      %20 = vector.broadcast %cst_15 : f32 to vector<8x128xf32>
      %c0_16 = arith.constant 0 : index
      %c0_17 = arith.constant 0 : index
      %21 = vector.load %arg7[%c0_16, %c0_17] : memref<8x128xf32, #tpu.memory_space<vmem>>, vector<8x128xf32>
      tpu.vector_store %arg7[%c0_16, %c0_17], %20 {strides = array<i32>} : memref<8x128xf32, #tpu.memory_space<vmem>>, vector<8x128xf32>,
    } else {
    }
    %c0 = arith.constant 0 : index
    %c0_1 = arith.constant 0 : index
    %3 = vector.load %arg1[%c0, %c0_1] : memref<8x32xf32, #tpu.memory_space<vmem>>, vector<8x32xf32>
    %4 = arith.truncf %3 : vector<8x32xf32> to vector<8x32xbf16>
    %c0_2 = arith.constant 0 : index
    %c0_3 = arith.constant 0 : index
    %5 = vector.load %arg2[%c0_2, %c0_3] : memref<32x32xbf16, #tpu.memory_space<vmem>>, vector<32x32xbf16>
    %cst = arith.constant dense<0.000000e+00> : vector<8x32xf32>
    %6 = tpu.matmul %4, %5, %cst {dimension_numbers = #tpu.dot_dimension_numbers<[1], [0], [0], [1], [0, 0, 1, 1], [], []>} : vector<8x32xbf16>, vector<32x32xbf16>, vector<8x32xf32> -> vector<8x32xf32>
    %c0_4 = arith.constant 0 : index
    %c0_5 = arith.constant 0 : index
    %7 = vector.load %arg3[%c0_4, %c0_5] : memref<1x32xf32, #tpu.memory_space<vmem>>, vector<1x32xf32>
    %8 = vector.broadcast %7 : vector<1x32xf32> to vector<8x32xf32>
    %9 = arith.addf %6, %8 : vector<8x32xf32>
    %10 = arith.truncf %9 : vector<8x32xf32> to vector<8x32xbf16>
    %11 = math.tanh %10 : vector<8x32xbf16>
    %c0_6 = arith.constant 0 : index
    %c0_7 = arith.constant 0 : index
    %12 = vector.load %arg7[%c0_6, %c0_7] : memref<8x128xf32, #tpu.memory_space<vmem>>, vector<8x128xf32>
    %c0_8 = arith.constant 0 : index
    %c0_9 = arith.constant 0 : index
    %13 = vector.load %arg4[%c0_8, %c0_9] : memref<32x128xbf16, #tpu.memory_space<vmem>>, vector<32x128xbf16>
    %cst_10 = arith.constant dense<0.000000e+00> : vector<8x128xf32>
    %14 = tpu.matmul %11, %13, %cst_10 {dimension_numbers = #tpu.dot_dimension_numbers<[1], [0], [0], [1], [0, 0, 1, 1], [], []>} : vector<8x32xbf16>, vector<32x128xbf16>, vector<8x128xf32> -> vector<8x128xf32>
    %15 = arith.addf %12, %14 : vector<8x128xf32>
    %c0_11 = arith.constant 0 : index
    %c0_12 = arith.constant 0 : index
    %16 = vector.load %arg7[%c0_11, %c0_12] : memref<8x128xf32, #tpu.memory_space<vmem>>, vector<8x128xf32>
    tpu.vector_store %arg7[%c0_11, %c0_12], %15 {strides = array<i32>} : memref<8x128xf32, #tpu.memory_space<vmem>>, vector<8x128xf32>,
    %c0_i32_13 = arith.constant 0 : i32
    %17 = arith.cmpi eq, %arg0, %c0_i32_13 : i32
    %18 = arith.extui %17 : i1 to i32
    %c0_i32_14 = arith.constant 0 : i32
    %19 = arith.cmpi ne, %18, %c0_i32_14 : i32
    scf.if %19 {
      %c0_15 = arith.constant 0 : index
      %c0_16 = arith.constant 0 : index
      %20 = vector.load %arg7[%c0_15, %c0_16] : memref<8x128xf32, #tpu.memory_space<vmem>>, vector<8x128xf32>
      %c0_17 = arith.constant 0 : index
      %c0_18 = arith.constant 0 : index
      %21 = vector.load %arg5[%c0_17, %c0_18] : memref<1x128xf32, #tpu.memory_space<vmem>>, vector<1x128xf32>
      %22 = vector.broadcast %21 : vector<1x128xf32> to vector<8x128xf32>
      %23 = arith.addf %20, %22 : vector<8x128xf32>
      %c0_19 = arith.constant 0 : index
      %c0_20 = arith.constant 0 : index
      %24 = vector.load %arg6[%c0_19, %c0_20] : memref<8x128xf32, #tpu.memory_space<vmem>>, vector<8x128xf32>
      tpu.vector_store %arg6[%c0_19, %c0_20], %23 {strides = array<i32>} : memref<8x128xf32, #tpu.memory_space<vmem>>, vector<8x128xf32>,
    } else {
    }
    return
  }
  func.func @transform_0(%arg0: i32) -> (i32, i32) {
    %c0_i32 = arith.constant 0 : i32
    %c0_i32_0 = arith.constant 0 : i32
    %c0_i32_1 = arith.constant 0 : i32
    return %c0_i32, %c0_i32_0 : i32, i32
  }
  func.func @transform_1(%arg0: i32) -> (i32, i32) {
    %c0_i32 = arith.constant 0 : i32
    %c0_i32_0 = arith.constant 0 : i32
    return %c0_i32, %arg0 : i32, i32
  }
  func.func @transform_2(%arg0: i32) -> (i32, i32) {
    %c0_i32 = arith.constant 0 : i32
    %c0_i32_0 = arith.constant 0 : i32
    return %c0_i32, %arg0 : i32, i32
  }
  func.func @transform_3(%arg0: i32) -> (i32, i32) {
    %c0_i32 = arith.constant 0 : i32
    %c0_i32_0 = arith.constant 0 : i32
    return %arg0, %c0_i32 : i32, i32
  }
  func.func @transform_4(%arg0: i32) -> (i32, i32) {
    %c0_i32 = arith.constant 0 : i32
    %c0_i32_0 = arith.constant 0 : i32
    %c0_i32_1 = arith.constant 0 : i32
    return %c0_i32, %c0_i32_0 : i32, i32
  }
  func.func @transform_5(%arg0: i32) -> (i32, i32) {
    %c0_i32 = arith.constant 0 : i32
    %c0_i32_0 = arith.constant 0 : i32
    %c0_i32_1 = arith.constant 0 : i32
    return %c0_i32, %c0_i32_0 : i32, i32
  }
}

</mosaic_0001>

<bundles_post_ra>
// kernel: roberta_classification_head.1
= control target key start
LH: loop header
LB: loop body
LE: loop exit
PB: predicated region body
PF: predicated region fallthrough
CT: control target
= control target key end

     0   :  { %10 = vsyncpa [#allocation4], 0  ;;  %s190_s21 = smov [#allocation3]   ;;  %s191_s23 = smov 64   ;;  %s244_s0 = inlined_call_operand.vmem [shape: f32[8,32], index: 0, kind: input, shape index: {}]   ;;  %s245_s1 = inlined_call_operand.vmem [shape: bf16[32,32], index: 1, kind: input, shape index: {}]   ;;  %s246_s2 = inlined_call_operand.vmem [shape: f32[1,32], index: 2, kind: input, shape index: {}]   ;;  %s247_s3 = inlined_call_operand.hbm [shape: bf16[32,128], index: 3, kind: input, shape index: {}]   ;;  %s248_s4 = inlined_call_operand.vmem [shape: f32[1,128], index: 4, kind: input, shape index: {}]   ;;  %s249_s5 = inlined_call_operand.vmem [shape: f32[8,128], index: 5, kind: output, shape index: {}]  }
   0x1   :  { %s21_s20 = sshll.u32 %s247_s3, 4  ;;  %s23_s22 = sshll.u32 %s190_s21, 4  ;;  %s22_s20 = int_to_ptr.hbm [resolvable:$true] %s21_s20  ;;  %s24_s22 = int_to_ptr.vmem [resolvable:$true] %s23_s22 }
   0x2   :  { %s192_s24 = smov 4  }
   0x3   :  { %29 = dma.hbm_to_vmem [thread:$0]  %s22_s20, 256, %s24_s22, [#allocation4], %s191_s23, %s191_s23, %s192_s24  }
   0x4   :  { %188 = dma.done.wait [#allocation4], 256  }
   0x5   :  { %189 = vsyncadd [#allocation4], 4294967040  ;;  %v154_v0 = vld [vmem:[%s245_s1 + $0x8] sm:$0xff]  ;;  %v153_v1 = vld [vmem:[%s245_s1] sm:$0xff]  ;;  %vm64_vm0 = vcmask 261120  }
   0x6   :  { %74 = vmatpush.bf16.msra.mxu0 %v154_v0  ;;  %v42_v2 = vld [vmem:[%s244_s0] sm:$0xff]  ;;  %v156_v4 = vld [vmem:[#allocation3 + $0x8] sm:$0xff] }
   0x7   :  { %v43_v3 = vpack.c.bf16 %v42_v2, %v42_v2  ;;  %111 = vmatpush.bf16.msra.mxu1 %v156_v4  ;;  %v155_v5 = vld [vmem:[#allocation3] sm:$0xff] }
   0x8   :  { %v160_v6 = vld [vmem:[%s246_s2] ss:$0 sm:$0xff] }
   0x9   :  { %v161_v14 = vld [vmem:[%s248_s4] ss:$0 sm:$0xff] }
   0xa   :  { %75 = vmatpush.bf16.msra.mxu0 %v153_v1 }
   0xb   :  { %112 = vmatpush.bf16.msra.mxu1 %v155_v5 }
   0xd   :  { %143 = vmatmul.msk.bf16.vlgmr.msra.gmra.mxu0 %vm64_vm0, %v43_v3 }
  0x8a   :  { %v77_v7 = vpop.f32.mrf.mxu0 }
  0x8b   :  { %v78_v8 = vadd.f32 %v160_v6, %v77_v7 }
  0x8d   :  { %v81_v9 = vpack.c.bf16 %v78_v8, %v78_v8 }
  0x8f   :  { %v82_v10 = vunpack.c.l.bf16 %v81_v9 }
  0x91   :  { %162 = vtanh.f32 %v82_v10 }
  0x92   :  { %v79_v11 = vpop.f32.mrf.mxu0 }
  0x97   :  { %v163_v12 = vpop.eup %162 }
  0x98   :  { %v84_v13 = vpack.c.bf16 %v163_v12, %v163_v12 }
  0x9a   :  { %152 = vmatmul.msk.bf16.vlgmr.msra.gmra.mxu1 %vm64_vm0, %v84_v13 }
 0x117   :  { %v114_v15 = vpop.f32.mrf.mxu1 }
 0x118   :  { %v128_v16 = vadd.f32 %v161_v14, %v114_v15 }
 0x11a   :  { %129 = vst [vmem:[%s249_s5] sm:$0xff] %v128_v16 }
 0x11f   :  { %v116_v17 = vpop.f32.mrf.mxu1 }
 0x120   :  { %134 = vsyncpa [#allocation4], 1 }

</bundles_post_ra>
